<compile_context>
chip_gen: v7x
topology: tpu7x:2x2x1
jax: 0.10.0
libtpu: 0.0.40
codegen_flags: <defaults>
</compile_context>

<pallas_src>
import jax
import jax.numpy as jnp
from jax.experimental import pallas as pl
from jax.experimental.pallas import tpu as pltpu


# Below this many bytes a plain fused XLA multiply beats pallas_call launch +
# pipeline warm-up/drain + reshape plumbing.
_SMALL_INPUT_BYTES = 4 << 20  # 4 MiB


def _cdiv(a: int, b: int) -> int:
    return -(-a // b)


def _sublane(dtype) -> int:
    # Packed-sublane multiple: 8 for f32, 16 for bf16, 32 for int8/fp8.
    return max(8, 32 // jnp.dtype(dtype).itemsize)


def _pick_cols(total: int):
    # Widest lane-dense last dim that tiles the flat tensor exactly
    # (full-width unmasked vst on the store path).
    for c in (2048, 1024, 512, 256, 128):
        if total % c == 0:
            return c
    return None


def _tpu_tuning():
    """Returns (block_bytes, vmem_cap_bytes, num_tensorcores) for this TPU gen."""
    block_bytes, vmem_cap, num_tc = 2 << 20, 32 << 20, 1  # conservative default
    try:
        kind = jax.devices()[0].device_kind.lower()
    except Exception:
        kind = ""
    if "v5 lite" in kind or "v5lite" in kind or "v5e" in kind:
        # v5e: ~0.8 TB/s HBM, 16 MiB default scoped VMEM -> 2-3 MiB sweet spot.
        block_bytes, vmem_cap, num_tc = 3 << 20, 48 << 20, 1
    elif "v4" in kind or "v5" in kind:
        # v4 / v5p megacore: two TCs share the grid under "parallel".
        block_bytes, vmem_cap, num_tc = 4 << 20, 64 << 20, 2
    elif "v6" in kind:
        # v6e: ~1.4 TB/s HBM, 128 MiB physical VMEM.
        block_bytes, vmem_cap, num_tc = 6 << 20, 80 << 20, 1
    elif "7" in kind:
        # v7x: ~3.2 TB/s HBM per TC, only 64 MiB physical VMEM, 2 TCs.
        block_bytes, vmem_cap, num_tc = 8 << 20, 44 << 20, 2
    try:
        phys = getattr(pltpu.get_tpu_info(), "vmem_capacity_bytes", None)
        if phys:
            vmem_cap = min(vmem_cap, int(0.7 * phys))
    except Exception:
        pass
    return block_bytes, vmem_cap, num_tc


def _balance_steps(rows: int, row_tile: int, sub: int, num_tc: int) -> int:
    """Shrink row_tile (at sublane granularity) so the 1-D grid step count is a
    multiple of the TensorCore count — keeps both v7x cores equally loaded."""
    if num_tc <= 1:
        return row_tile
    steps = _cdiv(rows, row_tile)
    if steps % num_tc == 0:
        return row_tile
    max_steps = max(1, rows // sub)
    base = (steps // num_tc) * num_tc
    for n in (base, base + num_tc, base + 2 * num_tc):
        if n < num_tc or n > max_steps:
            continue
        cand = max(sub, _cdiv(_cdiv(rows, n), sub) * sub)
        if cand <= rows and _cdiv(rows, cand) % num_tc == 0:
            return cand
    return row_tile


def _scale_kernel(scale_ref, x_ref, o_ref):
    # scale_ref: (1, 1) f32 scalar in SMEM; x_ref / o_ref: VMEM tiles.
    s = scale_ref[0, 0]
    # Multiply in f32 (matches torch: input * float32 parameter), cast to the
    # promoted output dtype on store.
    o_ref[...] = (x_ref[...] * s).astype(o_ref.dtype)


def scale_forward(
    x: jax.Array,
    scale: jax.Array,
    *,
    force_pallas: bool = False,
    block_bytes: int | None = None,
) -> jax.Array:
    """x: any shape (e.g. NCHW); scale: shape (1,) f32 (the nn.Parameter)."""
    orig_shape = x.shape
    # torch promotion: input * float32 tensor -> promoted dtype (f32 for bf16/int inputs).
    out_dtype = jnp.result_type(x.dtype, scale.dtype)
    total = x.size
    in_item = jnp.dtype(x.dtype).itemsize
    out_item = jnp.dtype(out_dtype).itemsize

    scale_f32 = scale.reshape(()).astype(jnp.float32)

    def _xla_path():
        # Fused elementwise multiply already hits the HBM roofline.
        return (x * scale_f32).astype(out_dtype)

    if total == 0:
        return _xla_path()

    cols = _pick_cols(total)
    small = total * max(in_item, out_item) < _SMALL_INPUT_BYTES
    if cols is None or (small and not force_pallas):
        # Ragged flat length (not a multiple of 128) or tiny tensor: the XLA
        # multiply is strictly cheaper than any pad/slice or launch overhead.
        return _xla_path()

    auto_block, vmem_cap, num_tc = _tpu_tuning()
    if block_bytes is None:
        block_bytes = auto_block

    rows = total // cols
    sub = _sublane(x.dtype)

    # ---- choose the row tile (~block_bytes per block, sublane-aligned) ------
    target_rows = max(sub, block_bytes // (cols * max(in_item, out_item)))
    row_tile = (min(target_rows, rows) // sub) * sub
    if row_tile == 0:
        row_tile = rows                      # fewer rows than one sublane pack: full extent
    row_tile = min(row_tile, rows)
    row_tile = _balance_steps(rows, row_tile, sub, num_tc)

    # Safety net: keep double-buffered (in + out) blocks inside the scoped-VMEM cap.
    while row_tile > sub and 2 * row_tile * cols * (in_item + out_item) > vmem_cap:
        row_tile = max(sub, ((row_tile // 2) // sub) * sub)

    x2d = x.reshape(rows, cols)
    grid = (_cdiv(rows, row_tile),)
    scale_smem = scale_f32.reshape(1, 1)

    # ---- compiler params -----------------------------------------------------
    cp_kwargs = dict(dimension_semantics=("parallel",))
    needed = 2 * row_tile * cols * (in_item + out_item)   # 2-deep buffers, in + out
    if needed > (12 << 20):
        cp_kwargs["vmem_limit_bytes"] = int(min(vmem_cap, needed + needed // 2))

    out2d = pl.pallas_call(
        _scale_kernel,
        out_shape=jax.ShapeDtypeStruct((rows, cols), out_dtype),
        grid=grid,
        in_specs=[
            pl.BlockSpec(memory_space=pltpu.MemorySpace.SMEM),    # scale scalar
            pl.BlockSpec((row_tile, cols), lambda i: (i, 0)),     # input tile
        ],
        out_specs=pl.BlockSpec((row_tile, cols), lambda i: (i, 0)),
        compiler_params=pltpu.CompilerParams(**cp_kwargs),
    )(scale_smem, x2d)

    return out2d.reshape(orig_shape)


if __name__ == "__main__":
    key = jax.random.PRNGKey(0)
    k1, k2, k3 = jax.random.split(key, 3)

    # Deterministic parameter init, matching nn.Parameter(torch.FloatTensor([0.001]))
    scale_param = jnp.array([0.001], dtype=jnp.float32)

    # Test 1: the module's canonical small NCHW input (single full-extent block).
    x1 = jax.random.normal(k1, (2, 4, 16, 16), dtype=jnp.float32)
    out1 = jax.block_until_ready(scale_forward(x1, scale_param, force_pallas=True))
    assert out1.shape == x1.shape and out1.dtype == jnp.float32
    assert jnp.allclose(out1, x1 * scale_param[0], rtol=1e-6, atol=1e-6)

    # Test 2: multi-step parallel grid with a ragged (masked) last block.
    x2 = jax.random.normal(k2, (3, 4, 64, 64), dtype=jnp.float32)
    out2 = jax.block_until_ready(
        scale_forward(x2, scale_param, force_pallas=True, block_bytes=128 * 1024)
    )
    assert out2.shape == x2.shape and out2.dtype == jnp.float32
    assert jnp.allclose(out2, x2 * scale_param[0], rtol=1e-6, atol=1e-6)

    # Test 3: bf16 input promotes to f32 (torch: bf16 tensor * f32 parameter -> f32).
    x3 = jax.random.normal(k3, (2, 4, 16, 16), dtype=jnp.bfloat16)
    out3 = jax.block_until_ready(scale_forward(x3, scale_param, force_pallas=True))
    ref3 = x3.astype(jnp.float32) * scale_param[0]
    assert out3.shape == x3.shape and out3.dtype == jnp.float32
    assert jnp.allclose(out3, ref3, rtol=1e-6, atol=1e-6)

    # Test 4: ragged / small sizes take the fused-XLA fallback (no pad round-trip).
    x4 = jax.random.normal(k1, (2, 3, 5, 7), dtype=jnp.float32)
    out4 = jax.block_until_ready(scale_forward(x4, scale_param))
    assert out4.shape == x4.shape
    assert jnp.allclose(out4, x4 * scale_param[0], rtol=1e-6, atol=1e-6)

    print("KERNEL_OK")
</pallas_src>

<mosaic_0001>
module attributes {stable_mosaic.version = 11 : i64} {
  func.func @_scale_kernel(%arg0: i32, %arg1: memref<1x1xf32, #tpu.memory_space<smem>>, %arg2: memref<1x2048xf32, #tpu.memory_space<vmem>>, %arg3: memref<1x2048xf32, #tpu.memory_space<vmem>>) attributes {dimension_semantics = [#tpu.dimension_semantics<parallel>], iteration_bounds = array<i64: 1>, scalar_prefetch = 0 : i64, scratch_operands = 0 : i64, tpu.core_type = #tpu.core_type<tc>, window_params = [{transform_indices = @transform_0, window_bounds = array<i64: 1, 1>}, {transform_indices = @transform_1, window_bounds = array<i64: 1, 2048>}, {transform_indices = @transform_2, window_bounds = array<i64: 1, 2048>}]} {
    %c0 = arith.constant 0 : index
    %c0_0 = arith.constant 0 : index
    %0 = memref.load %arg1[%c0, %c0_0] : memref<1x1xf32, #tpu.memory_space<smem>>
    %c0_1 = arith.constant 0 : index
    %c0_2 = arith.constant 0 : index
    %1 = vector.load %arg2[%c0_1, %c0_2] : memref<1x2048xf32, #tpu.memory_space<vmem>>, vector<1x2048xf32>
    %2 = vector.broadcast %0 : f32 to vector<1x2048xf32>
    %3 = arith.mulf %1, %2 : vector<1x2048xf32>
    %c0_3 = arith.constant 0 : index
    %c0_4 = arith.constant 0 : index
    %4 = vector.load %arg3[%c0_3, %c0_4] : memref<1x2048xf32, #tpu.memory_space<vmem>>, vector<1x2048xf32>
    tpu.vector_store %arg3[%c0_3, %c0_4], %3 {strides = array<i32>} : memref<1x2048xf32, #tpu.memory_space<vmem>>, vector<1x2048xf32>,
    return
  }
  func.func @transform_0(%arg0: i32) -> (i32, i32) {
    %c0_i32 = arith.constant 0 : i32
    %c0_i32_0 = arith.constant 0 : i32
    %c0_i32_1 = arith.constant 0 : i32
    return %c0_i32, %c0_i32_0 : i32, i32
  }
  func.func @transform_1(%arg0: i32) -> (i32, i32) {
    %c0_i32 = arith.constant 0 : i32
    %c0_i32_0 = arith.constant 0 : i32
    return %arg0, %c0_i32 : i32, i32
  }
  func.func @transform_2(%arg0: i32) -> (i32, i32) {
    %c0_i32 = arith.constant 0 : i32
    %c0_i32_0 = arith.constant 0 : i32
    return %arg0, %c0_i32 : i32, i32
  }
}

</mosaic_0001>

<bundles_post_ra>
// kernel: tpu_custom_call.1
= control target key start
LH: loop header
LB: loop body
LE: loop exit
PB: predicated region body
PF: predicated region fallthrough
CT: control target
= control target key end

     0   :  { %8 = vsyncpa [#allocation4], 0  ;;  %s142_s0 = inlined_call_operand.<no memory space> [shape: f32[1,1], index: 0, kind: input, shape index: {}]   ;;  %s143_s1 = inlined_call_operand.hbm [shape: f32[1,2048], index: 1, kind: input, shape index: {}]   ;;  %s144_s2 = inlined_call_operand.hbm [shape: f32[1,2048], index: 2, kind: output, shape index: {}]  }
   0x1   :  { %9 = vsyncpa [#allocation5], 0  ;;  %s98_s9 = smov [#allocation3]   ;;  %s50_s13 = scalar_lea.hbm %s143_s1, 256 }
   0x2   :  { %s18_s10 = sshll.u32 %s98_s9, 4  ;;  %p51_p0 = scmp.ne.s32.totalorder %s143_s1, %s50_s13  ;;  %s19_s10 = int_to_ptr.vmem [resolvable:$true] %s18_s10 }
   0x3   :  { %p54_p1 = scmp.lt.u32.totalorder %s50_s13, %s143_s1 }
   0x5   :  { %p56_p2 = pnand %p54_p1, %p51_p0 }
   0x7   :  { %59 = shalt.err (!%p56_p2)
}
   0x8   :  { %s60_s18 = scalar_lea.vmem %s19_s10, 256  ;;  %p65_p4 = scmp.lt.s32.totalorder %s19_s10, %s19_s10 }
   0x9   :  { %p61_p3 = scmp.ne.s32.totalorder %s19_s10, %s60_s18  ;;  %p66_p5 = scmp.lt.s32.totalorder %s60_s18, %s60_s18 }
   0xb   :  { %p67_p6 = por %p66_p5, %p65_p4 }
   0xd   :  { %p68_p7 = pnand %p67_p6, %p61_p3 }
   0xf   :  { %71 = shalt.err (!%p68_p7)
}
  0x10   :  { %21 = dma.hbm_to_vmem [thread:$0]  %s143_s1, 256, %s19_s10, [#allocation4]  }
  0x11   :  { %94 = dma.done.wait [#allocation4], 256  }
  0x12   :  { %95 = vsyncadd [#allocation4], 4294967040  ;;  %v28_v0 = vstv %s142_s0  ;;  %s99_s23 = smov [#allocation6]   ;;  %v26_v1 = vld [vmem:[#allocation3] sm:$0xff]  ;;  %v27_v2 = vld [vmem:[#allocation3 + $0x8] sm:$0xff] }
  0x13   :  { %s39_s24 = sshll.u32 %s99_s23, 4  ;;  %v29_v3 = vmul.f32 %v28_v0, %v26_v1  ;;  %v30_v4 = vmul.f32 %v28_v0, %v27_v2  ;;  %s40_s24 = int_to_ptr.vmem [resolvable:$true] %s39_s24 }
  0x14   :  { %s72_s25 = scalar_lea.vmem %s40_s24, 256  ;;  %p77_p9 = scmp.lt.s32.totalorder %s40_s24, %s40_s24 }
  0x15   :  { %31 = vst [vmem:[#allocation6] sm:$0xff] %v29_v3  ;;  %32 = vst [vmem:[#allocation6 + $0x8] sm:$0xff] %v30_v4  ;;  %p73_p8 = scmp.ne.s32.totalorder %s40_s24, %s72_s25  ;;  %p78_p10 = scmp.lt.s32.totalorder %s72_s25, %s72_s25 }
  0x17   :  { %p79_p11 = por %p78_p10, %p77_p9 }
  0x19   :  { %p80_p12 = pnand %p79_p11, %p73_p8 }
  0x1b   :  { %83 = shalt.err (!%p80_p12)
}
  0x1c   :  { %s84_s0 = scalar_lea.hbm %s144_s2, 256 }
  0x1d   :  { %p85_p13 = scmp.ne.s32.totalorder %s144_s2, %s84_s0  ;;  %p88_p0 = scmp.lt.u32.totalorder %s84_s0, %s144_s2 }
  0x1f   :  { %p90_p1 = pnand %p88_p0, %p85_p13 }
  0x21   :  { %93 = shalt.err (!%p90_p1)
}
  0x22   :  { %42 = dma.vmem_to_hbm [thread:$0]  %s40_s24, 256, %s144_s2, [#allocation5]  }
  0x23   :  { %96 = dma.done.wait [#allocation5], 256  }
  0x24   :  { %97 = vsyncadd [#allocation5], 4294967040 }
  0x25   :  { %46 = vsyncpa [#allocation4], 1 }
  0x26   :  { %47 = vsyncpa [#allocation5], 1 }

</bundles_post_ra>
